<compile_context>
chip_gen: v6e
topology: v6e:2x2x1
jax: 0.10.0
libtpu: 0.0.40
codegen_flags: <defaults>
</compile_context>

<pallas_src>
import functools
import math

import jax
import jax.numpy as jnp
from jax import lax
from jax.experimental import pallas as pl
from jax.experimental.pallas import tpu as pltpu


# ----------------------------------------------------------------------------
# Hardware-aware configuration (VMEM budget + tile targets)
# ----------------------------------------------------------------------------
def _vmem_capacity_bytes():
    try:
        info = pltpu.get_tpu_info()
        for name in ("vmem_capacity_bytes", "vmem_size_bytes", "vmem_bytes"):
            v = getattr(info, name, None)
            if v:
                return int(v)
    except Exception:
        pass
    return 64 * 1024 * 1024  # conservative default: v7x per-TensorCore VMEM


@functools.lru_cache(maxsize=None)
def _hw_config():
    cap = _vmem_capacity_bytes()
    big = cap >= 96 * 1024 * 1024           # v5e / v6e: 128 MiB; v7x: 64 MiB
    return {
        "vmem_limit": min((cap // 8) * 5, 96 * 1024 * 1024),  # ~80 MiB / ~40 MiB
        "tm": 512 if big else 256,
        "tn": 512 if big else 256,
        "tk": 2048 if big else 1024,
        "tq": 512 if big else 256,
        "tkv": 512 if big else 256,
    }


def _pick_tile(dim, target, align):
    """Largest `align`-multiple tile <= target that divides `dim`.

    Returns `dim` itself when it already fits `target` (a full-extent block is
    always layout-legal), and None when no aligned divisor exists.
    """
    if dim <= target:
        return dim
    t = (target // align) * align
    while t >= align:
        if dim % t == 0:
            return t
        t -= align
    return None


# ----------------------------------------------------------------------------
# Tiled linear kernels:  y = x @ W^T + b   (W in PyTorch [out, in] layout, bf16)
# ----------------------------------------------------------------------------
def _linear_fullk_kernel(x_ref, w_ref, b_ref, o_ref):
    # Whole K in one pass: no accumulator scratch, no init/finalize phases.
    x = x_ref[...].astype(jnp.bfloat16)
    acc = lax.dot_general(x, w_ref[...], (((1,), (1,)), ((), ())),
                          preferred_element_type=jnp.float32)
    o_ref[...] = (acc + b_ref[...]).astype(o_ref.dtype)


def _linear_tiledk_kernel(x_ref, w_ref, b_ref, o_ref, acc_ref):
    k_idx = pl.program_id(2)

    @pl.when(k_idx == 0)
    def _():
        acc_ref[...] = jnp.zeros_like(acc_ref)

    x = x_ref[...].astype(jnp.bfloat16)
    acc_ref[...] += lax.dot_general(x, w_ref[...], (((1,), (1,)), ((), ())),
                                    preferred_element_type=jnp.float32)

    @pl.when(k_idx == pl.num_programs(2) - 1)
    def _():
        o_ref[...] = (acc_ref[...] + b_ref[...]).astype(o_ref.dtype)


def pallas_linear(x, w, b, *, out_dtype=jnp.bfloat16):
    """x: (B, L, K);  w: (N, K) bf16;  b: (N,) f32.  Returns (B, L, N)."""
    B, L, K = x.shape
    N = w.shape[0]
    M = B * L
    cfg = _hw_config()

    x2 = x.reshape(M, K)
    b2 = b.reshape(1, N).astype(jnp.float32)

    tm = _pick_tile(M, cfg["tm"], 16) or _pick_tile(M, cfg["tm"], 8)
    if tm is None:
        # Awkward M: pad the row dim to a tile multiple instead of falling back
        # to a (possibly VMEM-busting) full-M block.
        tm = cfg["tm"]
        m_pad = ((M + tm - 1) // tm) * tm
        x2 = jnp.pad(x2, ((0, m_pad - M), (0, 0)))
    else:
        m_pad = M
    tn = _pick_tile(N, cfg["tn"], 128) or N
    tk = _pick_tile(K, cfg["tk"], 128) or K

    if tk == K:
        out = pl.pallas_call(
            _linear_fullk_kernel,
            out_shape=jax.ShapeDtypeStruct((m_pad, N), out_dtype),
            grid=(m_pad // tm, N // tn),
            in_specs=[pl.BlockSpec((tm, K), lambda i, j: (i, 0)),
                      pl.BlockSpec((tn, K), lambda i, j: (j, 0)),
                      pl.BlockSpec((1, tn), lambda i, j: (0, j))],
            out_specs=pl.BlockSpec((tm, tn), lambda i, j: (i, j)),
            compiler_params=pltpu.CompilerParams(
                dimension_semantics=("parallel", "parallel"),
                vmem_limit_bytes=cfg["vmem_limit"]),
        )(x2, w, b2)
    else:
        out = pl.pallas_call(
            _linear_tiledk_kernel,
            out_shape=jax.ShapeDtypeStruct((m_pad, N), out_dtype),
            grid=(m_pad // tm, N // tn, K // tk),
            in_specs=[pl.BlockSpec((tm, tk), lambda i, j, k: (i, k)),
                      pl.BlockSpec((tn, tk), lambda i, j, k: (j, k)),
                      pl.BlockSpec((1, tn), lambda i, j, k: (0, j))],
            out_specs=pl.BlockSpec((tm, tn), lambda i, j, k: (i, j)),
            scratch_shapes=[pltpu.VMEM((tm, tn), jnp.float32)],
            compiler_params=pltpu.CompilerParams(
                dimension_semantics=("parallel", "parallel", "arbitrary"),
                vmem_limit_bytes=cfg["vmem_limit"]),
        )(x2, w, b2)

    if m_pad != M:
        out = out[:M]
    return out.reshape(B, L, N)


# ----------------------------------------------------------------------------
# Flash-style scaled-dot-product attention (online softmax, probs never stored)
# ----------------------------------------------------------------------------
def _flash_attention_kernel(q_ref, k_ref, v_ref, o_ref, m_sc, l_sc, acc_sc):
    # q_ref: (H, tq, Dt) bf16; k_ref / v_ref: (H, tkv, Dt) bf16
    # o_ref: (1, tq, H*Dt); m_sc / l_sc: (H, tq) f32; acc_sc: (H, tq, Dt) f32
    kv = pl.program_id(2)

    @pl.when(kv == 0)
    def _():
        m_sc[...] = jnp.full_like(m_sc, -jnp.inf)
        l_sc[...] = jnp.zeros_like(l_sc)
        acc_sc[...] = jnp.zeros_like(acc_sc)

    q = q_ref[...]
    k = k_ref[...]
    v = v_ref[...]

    # score = q @ k^T (the 1/sqrt(Dt) scale is folded into the Q projection
    # weights), batched over heads, contracting the shared Dt axis directly.
    s = lax.dot_general(q, k, (((2,), (2,)), ((0,), (0,))),
                        preferred_element_type=jnp.float32)        # (H, tq, tkv)
    # TODO(synk): mask=None path only; the masked_fill branch of
    # ScaleDotProductAttention is not implemented.

    m_prev = m_sc[...]
    m_new = jnp.maximum(m_prev, jnp.max(s, axis=-1))               # (H, tq)
    alpha = jnp.exp(m_prev - m_new)                                # (H, tq)
    p = jnp.exp(s - m_new[:, :, None])                             # f32 stats
    l_sc[...] = alpha * l_sc[...] + jnp.sum(p, axis=-1)
    pv = lax.dot_general(p.astype(jnp.bfloat16), v,
                         (((2,), (1,)), ((0,), (0,))),
                         preferred_element_type=jnp.float32)       # (H, tq, Dt)
    acc_sc[...] = alpha[:, :, None] * acc_sc[...] + pv
    m_sc[...] = m_new

    @pl.when(kv == pl.num_programs(2) - 1)
    def _():
        inv_l = pl.reciprocal(l_sc[...], approx=True)              # (H, tq)
        out = acc_sc[...] * inv_l[:, :, None]                      # (H, tq, Dt)
        h, tq, dt = out.shape
        # Emit head-concatenated, lane-dense output: (tq, H*Dt).
        out = jnp.swapaxes(out, 0, 1).reshape(tq, h * dt)
        o_ref[0] = out.astype(o_ref.dtype)


def pallas_flash_attention(q_arr, k_arr, v_arr, slots):
    """q_arr/k_arr/v_arr: (S, B, H, L, Dt) bf16 packed per-head tensors
    (all three may alias the same array).  slots=(sq, sk, sv) selects the
    S-slot each operand reads.  Returns head-concatenated (B, L, H*Dt) bf16."""
    _, B, H, L, Dt = q_arr.shape
    cfg = _hw_config()
    tq = _pick_tile(L, cfg["tq"], 16) or _pick_tile(L, cfg["tq"], 8) or L
    tkv = _pick_tile(L, cfg["tkv"], 128) or _pick_tile(L, cfg["tkv"], 8) or L
    # TODO(synk): an L with no aligned divisor falls back to a full-L block;
    # padding + kv-tail masking would be needed to tile such lengths safely.
    grid = (B, L // tq, L // tkv)
    sq, sk, sv = slots

    q_spec = pl.BlockSpec((None, None, H, tq, Dt),
                          lambda b, qi, ki: (sq, b, 0, qi, 0))
    k_spec = pl.BlockSpec((None, None, H, tkv, Dt),
                          lambda b, qi, ki: (sk, b, 0, ki, 0))
    v_spec = pl.BlockSpec((None, None, H, tkv, Dt),
                          lambda b, qi, ki: (sv, b, 0, ki, 0))

    return pl.pallas_call(
        _flash_attention_kernel,
        out_shape=jax.ShapeDtypeStruct((B, L, H * Dt), jnp.bfloat16),
        grid=grid,
        in_specs=[q_spec, k_spec, v_spec],
        out_specs=pl.BlockSpec((1, tq, H * Dt), lambda b, qi, ki: (b, qi, 0)),
        scratch_shapes=[
            pltpu.VMEM((H, tq), jnp.float32),      # running max
            pltpu.VMEM((H, tq), jnp.float32),      # running denominator
            pltpu.VMEM((H, tq, Dt), jnp.float32),  # running numerator
        ],
        compiler_params=pltpu.CompilerParams(
            dimension_semantics=("parallel", "parallel", "arbitrary"),
            vmem_limit_bytes=cfg["vmem_limit"]),
    )(q_arr, k_arr, v_arr)


# ----------------------------------------------------------------------------
# MultiHeadAttention forward (thin JAX glue)
# ----------------------------------------------------------------------------
def _to_per_head(x, n_head, n_slots):
    """(B, L, S*H*Dt) -> (S, B, H, L, Dt): single packed transpose."""
    B, L, D = x.shape
    dt = D // (n_slots * n_head)
    return x.reshape(B, L, n_slots, n_head, dt).transpose(2, 0, 3, 1, 4)


def multi_head_attention(prepared, q, k, v, n_head):
    if (q is k) and (k is v):
        # Self-attention: one fused QKV projection (weights pre-concatenated in
        # prepare_params) then ONE packed per-head transpose — replaces three
        # slice copies + three split_heads transposes.
        qkv = pallas_linear(q, prepared["w_qkv"], prepared["b_qkv"],
                            out_dtype=jnp.bfloat16)                # (B, L, 3D)
        qkv = _to_per_head(qkv, n_head, 3)                         # (3, B, H, L, Dt)
        q_a = k_a = v_a = qkv
        slots = (0, 1, 2)
    else:
        q_p = pallas_linear(q, prepared["w_q"], prepared["b_q"], out_dtype=jnp.bfloat16)
        k_p = pallas_linear(k, prepared["w_k"], prepared["b_k"], out_dtype=jnp.bfloat16)
        v_p = pallas_linear(v, prepared["w_v"], prepared["b_v"], out_dtype=jnp.bfloat16)
        q_a = _to_per_head(q_p, n_head, 1)
        k_a = _to_per_head(k_p, n_head, 1)
        v_a = _to_per_head(v_p, n_head, 1)
        slots = (0, 0, 0)

    # Attention kernel returns the output already head-concatenated (B, L, D)
    # in bf16.  (The attention-probs tensor is dropped: the module discards it.)
    ctx = pallas_flash_attention(q_a, k_a, v_a, slots)

    # Final projection back to f32 (module output dtype).
    return pallas_linear(ctx, prepared["w_concat"], prepared["b_concat"],
                         out_dtype=jnp.float32)


# ----------------------------------------------------------------------------
# Parameters
# ----------------------------------------------------------------------------
def init_params(key, d_model):
    keys = jax.random.split(key, 8)
    scale = 1.0 / math.sqrt(d_model)

    def lin(kw, kb):
        w = jax.random.uniform(kw, (d_model, d_model), jnp.float32, -scale, scale)
        b = jax.random.uniform(kb, (d_model,), jnp.float32, -scale, scale)
        return w, b

    w_q_w, w_q_b = lin(keys[0], keys[1])
    w_k_w, w_k_b = lin(keys[2], keys[3])
    w_v_w, w_v_b = lin(keys[4], keys[5])
    w_c_w, w_c_b = lin(keys[6], keys[7])
    return {
        "w_q_w": w_q_w, "w_q_b": w_q_b,
        "w_k_w": w_k_w, "w_k_b": w_k_b,
        "w_v_w": w_v_w, "w_v_b": w_v_b,
        "w_concat_w": w_c_w, "w_concat_b": w_c_b,
    }


def prepare_params(params, d_model, n_head):
    """One-time weight prep: bf16 cast, fused QKV concat, score scale folded
    into the Q projection (mathematically identical to scaling q @ k^T)."""
    d_tensor = d_model // n_head
    scale = 1.0 / math.sqrt(d_tensor)
    w_q = (params["w_q_w"] * scale).astype(jnp.bfloat16)
    b_q = (params["w_q_b"] * scale).astype(jnp.float32)
    w_k = params["w_k_w"].astype(jnp.bfloat16)
    b_k = params["w_k_b"].astype(jnp.float32)
    w_v = params["w_v_w"].astype(jnp.bfloat16)
    b_v = params["w_v_b"].astype(jnp.float32)
    return {
        "w_q": w_q, "b_q": b_q,
        "w_k": w_k, "b_k": b_k,
        "w_v": w_v, "b_v": b_v,
        "w_qkv": jnp.concatenate([w_q, w_k, w_v], axis=0),   # (3D, D) bf16
        "b_qkv": jnp.concatenate([b_q, b_k, b_v], axis=0),   # (3D,)  f32
        "w_concat": params["w_concat_w"].astype(jnp.bfloat16),
        "b_concat": params["w_concat_b"].astype(jnp.float32),
    }


# ----------------------------------------------------------------------------
# Pure-JAX f32 reference (mirrors the PyTorch module) for tolerance validation
# ----------------------------------------------------------------------------
def _reference_mha(params, q, k, v, n_head):
    def lin(x, w, b):
        return x @ w.T + b

    q_p = lin(q, params["w_q_w"], params["w_q_b"])
    k_p = lin(k, params["w_k_w"], params["w_k_b"])
    v_p = lin(v, params["w_v_w"], params["w_v_b"])
    B, L, D = q_p.shape
    dt = D // n_head

    def split(t):
        return t.reshape(B, L, n_head, dt).transpose(0, 2, 1, 3)

    qh, kh, vh = split(q_p), split(k_p), split(v_p)
    s = jnp.einsum("bhqd,bhkd->bhqk", qh, kh) / math.sqrt(dt)
    p = jax.nn.softmax(s, axis=-1)
    o = jnp.einsum("bhqk,bhkd->bhqd", p, vh)
    o = o.transpose(0, 2, 1, 3).reshape(B, L, D)
    return lin(o, params["w_concat_w"], params["w_concat_b"])


if __name__ == "__main__":
    batch, seq, d_model, n_head = 2, 8, 32, 4

    key = jax.random.PRNGKey(0)
    k_params, k_x, k_k, k_v = jax.random.split(key, 4)

    params = init_params(k_params, d_model)
    prepared = prepare_params(params, d_model, n_head)

    x = jax.random.normal(k_x, (batch, seq, d_model), jnp.float32)
    k_in = jax.random.normal(k_k, (batch, seq, d_model), jnp.float32)
    v_in = jax.random.normal(k_v, (batch, seq, d_model), jnp.float32)

    # Self-attention path (q = k = v): fused QKV projection + packed per-head view.
    out_self = multi_head_attention(prepared, x, x, x, n_head)
    # Cross-attention path (distinct q/k/v): unfused projections, same kernels.
    out_cross = multi_head_attention(prepared, x, k_in, v_in, n_head)
    out_self, out_cross = jax.block_until_ready((out_self, out_cross))

    assert out_self.shape == (batch, seq, d_model)
    assert out_cross.shape == (batch, seq, d_model)

    # Tolerance-validate bf16-operand kernels against the f32 reference.
    ref_self = _reference_mha(params, x, x, x, n_head)
    ref_cross = _reference_mha(params, x, k_in, v_in, n_head)
    assert jnp.allclose(out_self, ref_self, rtol=5e-2, atol=5e-2), (
        float(jnp.max(jnp.abs(out_self - ref_self))))
    assert jnp.allclose(out_cross, ref_cross, rtol=5e-2, atol=5e-2), (
        float(jnp.max(jnp.abs(out_cross - ref_cross))))

    print("KERNEL_OK")
</pallas_src>

<mosaic_0001>
module attributes {stable_mosaic.version = 11 : i64} {
  func.func @_linear_fullk_kernel(%arg0: i32, %arg1: i32, %arg2: memref<16x32xf32, #tpu.memory_space<vmem>>, %arg3: memref<96x32xbf16, #tpu.memory_space<vmem>>, %arg4: memref<1x96xf32, #tpu.memory_space<vmem>>, %arg5: memref<16x96xbf16, #tpu.memory_space<vmem>>) attributes {dimension_semantics = [#tpu.dimension_semantics<parallel>, #tpu.dimension_semantics<parallel>], iteration_bounds = array<i64: 1, 1>, scalar_prefetch = 0 : i64, scratch_operands = 0 : i64, tpu.core_type = #tpu.core_type<tc>, window_params = [{transform_indices = @transform_0, window_bounds = array<i64: 16, 32>}, {transform_indices = @transform_1, window_bounds = array<i64: 96, 32>}, {transform_indices = @transform_2, window_bounds = array<i64: 1, 96>}, {transform_indices = @transform_3, window_bounds = array<i64: 16, 96>}]} {
    %c0 = arith.constant 0 : index
    %c0_0 = arith.constant 0 : index
    %0 = vector.load %arg2[%c0, %c0_0] : memref<16x32xf32, #tpu.memory_space<vmem>>, vector<16x32xf32>
    %1 = arith.truncf %0 : vector<16x32xf32> to vector<16x32xbf16>
    %c0_1 = arith.constant 0 : index
    %c0_2 = arith.constant 0 : index
    %2 = vector.load %arg3[%c0_1, %c0_2] : memref<96x32xbf16, #tpu.memory_space<vmem>>, vector<96x32xbf16>
    %cst = arith.constant dense<0.000000e+00> : vector<16x96xf32>
    %3 = tpu.matmul %1, %2, %cst {dimension_numbers = #tpu.dot_dimension_numbers<[1], [1], [0], [0], [0, 0, 1, 0], [], []>} : vector<16x32xbf16>, vector<96x32xbf16>, vector<16x96xf32> -> vector<16x96xf32>
    %c0_3 = arith.constant 0 : index
    %c0_4 = arith.constant 0 : index
    %4 = vector.load %arg4[%c0_3, %c0_4] : memref<1x96xf32, #tpu.memory_space<vmem>>, vector<1x96xf32>
    %5 = vector.broadcast %4 : vector<1x96xf32> to vector<16x96xf32>
    %6 = arith.addf %3, %5 : vector<16x96xf32>
    %7 = arith.truncf %6 : vector<16x96xf32> to vector<16x96xbf16>
    %c0_5 = arith.constant 0 : index
    %c0_6 = arith.constant 0 : index
    %8 = vector.load %arg5[%c0_5, %c0_6] : memref<16x96xbf16, #tpu.memory_space<vmem>>, vector<16x96xbf16>
    tpu.vector_store %arg5[%c0_5, %c0_6], %7 {strides = array<i32>} : memref<16x96xbf16, #tpu.memory_space<vmem>>, vector<16x96xbf16>,
    return
  }
  func.func @transform_0(%arg0: i32, %arg1: i32) -> (i32, i32) {
    %c0_i32 = arith.constant 0 : i32
    %c0_i32_0 = arith.constant 0 : i32
    return %arg0, %c0_i32 : i32, i32
  }
  func.func @transform_1(%arg0: i32, %arg1: i32) -> (i32, i32) {
    %c0_i32 = arith.constant 0 : i32
    %c0_i32_0 = arith.constant 0 : i32
    return %arg1, %c0_i32 : i32, i32
  }
  func.func @transform_2(%arg0: i32, %arg1: i32) -> (i32, i32) {
    %c0_i32 = arith.constant 0 : i32
    %c0_i32_0 = arith.constant 0 : i32
    return %c0_i32, %arg1 : i32, i32
  }
  func.func @transform_3(%arg0: i32, %arg1: i32) -> (i32, i32) {
    %c0_i32 = arith.constant 0 : i32
    return %arg0, %arg1 : i32, i32
  }
}

</mosaic_0001>

<bundles_post_ra>
// kernel: tpu_custom_call.1
= control target key start
LH: loop header
LB: loop body
LE: loop exit
PB: predicated region body
PF: predicated region fallthrough
CT: control target
= control target key end

     0   :  { %v226_v1 = vmov 0.0   ;;  %vm68_vm0 = vcmask 261120   ;;  %vm227_vm1 = vmmov 0   ;;  %s288_s0 = inlined_call_operand.vmem [shape: f32[16,32], index: 0, kind: input, shape index: {}]   ;;  %s289_s1 = inlined_call_operand.vmem [shape: bf16[96,32], index: 1, kind: input, shape index: {}]   ;;  %s290_s2 = inlined_call_operand.vmem [shape: f32[1,96], index: 2, kind: input, shape index: {}]   ;;  %s291_s3 = inlined_call_operand.hbm [shape: bf16[16,96], index: 3, kind: output, shape index: {}]  }
   0x1   :  { %v198_v0 = vld [vmem:[%s289_s1 + $0x28] sm:$0xff]   ;;  %177 = vmatprep.subr.bf16.mxu0 %v226_v1  ;;  %v199_v3 = vld [vmem:[%s289_s1 + $0x20] sm:$0xff]   ;;  %189 = vmatprep.mubr.msk.bf16.mxu0 %vm227_vm1, %v226_v1 }
   0x2   :  { %v88_v2 = vsel %vm68_vm0, %v198_v0, 0 }
   0x3   :  { %178 = vmatpush3.bf16.xpose.msra.mxu0 %v88_v2 }
   0x4   :  { %179 = vmatprep.subr.bf16.mxu0 %v226_v1 }
   0x5   :  { %8 = vsyncpa [#allocation3], 0  ;;  %v85_v4 = vsel %vm68_vm0, %v199_v3, 0  ;;  %v200_v5 = vld [vmem:[%s289_s1 + $0x18] sm:$0xff]   ;;  %v201_v7 = vld [vmem:[%s289_s1 + $0x10] sm:$0xff]   ;;  %vm139_vm2 = vcmask 781312  }
   0x6   :  { %v82_v6 = vsel %vm68_vm0, %v200_v5, 0  ;;  %v79_v8 = vsel %vm68_vm0, %v201_v7, 0  ;;  %v202_v9 = vld [vmem:[%s289_s1 + $0x8] sm:$0xff]   ;;  %v203_v11 = vld [vmem:[%s289_s1] sm:$0xff]   ;;  %s228_s1 = smov [#allocation2]  }
   0x7   :  { %v76_v10 = vsel %vm68_vm0, %v202_v9, 0  ;;  %v73_v12 = vsel %vm68_vm0, %v203_v11, 0  ;;  %v16_v13 = vld [vmem:[%s288_s0] sm:$0xff]  ;;  %v17_v14 = vld [vmem:[%s288_s0 + $0x8] sm:$0xff]  ;;  %s147_s30 = sshll.u32 %s228_s1, 4  ;;  %s148_s30 = int_to_ptr.vmem [resolvable:$true] %s147_s30 }
   0x8   :  { %v18_v15 = vpack.c.bf16 %v17_v14, %v16_v13  ;;  %v158_v16 = vld [vmem:[%s290_s2] ss:$0 sm:$0xff]  ;;  %s204_s0 = scalar_lea.vmem %s148_s30, 128  ;;  %p209_p1 = scmp.lt.s32.totalorder %s148_s30, %s148_s30 }
   0x9   :  { %p205_p0 = scmp.ne.s32.totalorder %s148_s30, %s204_s0  ;;  %p210_p2 = scmp.lt.s32.totalorder %s204_s0, %s204_s0 }
   0xb   :  { %180 = vmatpush3.bf16.xpose.msra.mxu0 %v85_v4  ;;  %p211_p3 = por %p210_p2, %p209_p1 }
   0xc   :  { %181 = vmatprep.subr.bf16.mxu0 %v226_v1 }
   0xd   :  { %p212_p4 = pnand %p211_p3, %p205_p0 }
  0x13   :  { %182 = vmatpush3.bf16.xpose.msra.mxu0 %v82_v6 }
  0x14   :  { %183 = vmatprep.subr.bf16.mxu0 %v226_v1 }
  0x1b   :  { %184 = vmatpush3.bf16.xpose.msra.mxu0 %v79_v8 }
  0x1c   :  { %185 = vmatprep.subr.bf16.mxu0 %v226_v1 }
  0x23   :  { %186 = vmatpush3.bf16.xpose.msra.mxu0 %v76_v10 }
  0x24   :  { %187 = vmatprep.subr.bf16.mxu0 %v226_v1 }
  0x2b   :  { %188 = vmatpush3.bf16.xpose.msra.mxu0 %v73_v12 }
  0x32   :  { %190 = vmatmul.mubr.msk.bf16.vlgmr.msra.gmra.mxu0 %vm68_vm0, %v18_v15 }
  0xf2   :  { %v124_v17 = vpop.f32.mrf.mxu0 }
  0xf3   :  { %v125_v18 = vadd.f32 %v158_v16, %v124_v17 }
  0xf4   :  { %v191_v19 = vpop.f32.mrf.mxu0 }
  0xf5   :  { %v168_v20 = vpack.c.bf16 %v125_v18, %v125_v18 }
  0xf6   :  { %v127_v21 = vpop.f32.mrf.mxu0 }
  0xf7   :  { %140 = vst.msk [vmem:[#allocation2] sm:$0xf] %vm139_vm2, %v168_v20  ;;  %v128_v22 = vadd.f32 %v158_v16, %v127_v21 }
  0xf8   :  { %v192_v23 = vpop.f32.mrf.mxu0 }
  0xf9   :  { %v169_v24 = vpack.c.bf16 %v128_v22, %v128_v22 }
  0xfb   :  { %141 = vst.msk [vmem:[#allocation2 + $0x4] sm:$0xf] %vm139_vm2, %v169_v24 }
  0xfc   :  { %215 = shalt.err (!%p212_p4)
}
  0xfd   :  { %s229_s2 = smov 64   ;;  %s230_s4 = smov 4  }
  0xfe   :  { %153 = dma.vmem_to_hbm [thread:$0]  %s148_s30, 128, %s291_s3, [#allocation3], %s229_s2, %s229_s2, %s230_s4  }
  0xff   :  { %224 = dma.done.wait [#allocation3], 128  }
 0x100   :  { %225 = vsyncadd [#allocation3], 4294967168 }
 0x101   :  { %157 = vsyncpa [#allocation3], 1 }

</bundles_post_ra>
